<compile_context>
chip_gen: v7x
topology: tpu7x:2x2x1
jax: 0.10.0
libtpu: 0.0.40
codegen_flags: <defaults>
</compile_context>

<pallas_src>
import functools

import jax
import jax.numpy as jnp
from jax.experimental import pallas as pl
from jax.experimental.pallas import tpu as pltpu


def _round_up(x, m):
    return ((x + m - 1) // m) * m


def _fused_mlp_kernel(x_ref, *refs, layer_num, last_activation):
    """Fused L-layer MLP on one (TM, F_in_p) row tile.

    refs = (w0, b0, w1, b1, ..., w_{L-1}, b_{L-1}, o_ref).
    Per layer: h = relu(h @ w_i + b_i); ReLU skipped on the last layer when
    last_activation=False.  BN(eval) is already folded into w_i / b_i.
    """
    o_ref = refs[-1]
    h = x_ref[...]
    for i in range(layer_num):
        w = refs[2 * i][...]
        b = refs[2 * i + 1][...]
        z = jnp.dot(h, w, preferred_element_type=jnp.float32) + b
        if i < layer_num - 1 or last_activation:
            z = jnp.maximum(z, 0.0)
        h = z
    o_ref[...] = h.astype(o_ref.dtype)


def fold_and_pad_params(params):
    """Fold eval-mode BN + bias into each Linear and zero-pad feature dims to
    multiples of 128 (lane-dense).  Returns [(w, b)] with w0:(F_in_p, H_p),
    w_i>0:(H_p, H_p), b_i:(1, H_p).  Padded columns carry zero weight/bias so
    they stay exactly zero through every layer."""
    out = []
    for p in params:
        w = p["w_t"] * p["scale"]              # (F_in, H) * (1, H)
        b = p["b"] * p["scale"] + p["shift"]   # (1, H)
        fin, h = w.shape
        fin_p, h_p = _round_up(fin, 128), _round_up(h, 128)
        w_p = jnp.zeros((fin_p, h_p), jnp.float32).at[:fin, :h].set(w)
        b_p = jnp.zeros((1, h_p), jnp.float32).at[:, :h].set(b)
        out.append((w_p, b_p))
    return out


def fused_mlp_forward(x, folded_params, last_activation=True):
    """x: (N, F_in) f32. Returns padded (N_p, H_p) output."""
    N, F_in = x.shape
    layer_num = len(folded_params)
    F_in_p = folded_params[0][0].shape[0]
    H_p = folded_params[0][0].shape[1]

    # Row tile: big enough to pipeline well, small enough that the
    # double-buffered x/out tiles fit v7x's 32 MiB scoped VMEM with headroom.
    tm = min(512, _round_up(N, 8))
    while tm > 8 and 2 * tm * (F_in_p + H_p) * 4 > 24 * 1024 * 1024:
        tm //= 2
    N_p = _round_up(N, tm)

    # Zero-pad rows and input features (padded cols hit zero weight rows).
    x_p = jnp.zeros((N_p, F_in_p), jnp.float32).at[:N, :F_in].set(x)

    kernel = functools.partial(
        _fused_mlp_kernel, layer_num=layer_num, last_activation=last_activation
    )

    in_specs = [pl.BlockSpec((tm, F_in_p), lambda i: (i, 0))]
    flat_params = []
    for (w, b) in folded_params:
        # Constant index_map -> weights/biases stay resident in VMEM across the
        # whole row grid (no re-DMA per tile).
        in_specs.append(pl.BlockSpec(w.shape, lambda i: (0, 0)))
        in_specs.append(pl.BlockSpec(b.shape, lambda i: (0, 0)))
        flat_params += [w, b]

    # VMEM budget: double-buffered x/out tiles + resident weights/biases.
    weight_bytes = sum(w.size * 4 + b.size * 4 for (w, b) in folded_params)
    est = 2 * tm * (F_in_p + H_p) * 4 + weight_bytes
    vmem_limit = int(min(max(2 * est, 16 << 20), 48 << 20))

    return pl.pallas_call(
        kernel,
        out_shape=jax.ShapeDtypeStruct((N_p, H_p), jnp.float32),
        grid=(N_p // tm,),
        in_specs=in_specs,
        # Lane-dense output: last dim is the full (128-aligned) H_p.
        out_specs=pl.BlockSpec((tm, H_p), lambda i: (i, 0)),
        compiler_params=pltpu.CompilerParams(
            dimension_semantics=("parallel",),
            vmem_limit_bytes=vmem_limit,
        ),
    )(x_p, *flat_params)


def mlp_encoder_forward(x, edge_index, params, last_activation=True):
    # edge_index is unused by MLP_Encoder.forward (kept for signature parity).
    del edge_index
    N = x.shape[0]
    H = params[-1]["w_t"].shape[1]
    folded = fold_and_pad_params(params)
    out = fused_mlp_forward(x, folded, last_activation=last_activation)
    return out[:N, :H]


def make_params(key, input_dim, hidden_size, layer_num, use_bn=True, eps=1e-5):
    """Deterministic parameter init (shapes match the PyTorch module)."""
    params = []
    dims = [input_dim] + [hidden_size] * layer_num
    for i in range(layer_num):
        key, kw, kb, kg, kbt, km, kv = jax.random.split(key, 7)
        fan_in, fan_out = dims[i], dims[i + 1]
        bound = 1.0 / jnp.sqrt(fan_in)
        w = jax.random.uniform(kw, (fan_out, fan_in), jnp.float32, -bound, bound)
        b = jax.random.uniform(kb, (fan_out,), jnp.float32, -bound, bound)
        if use_bn:
            gamma = 1.0 + 0.1 * jax.random.normal(kg, (fan_out,), jnp.float32)
            beta = 0.1 * jax.random.normal(kbt, (fan_out,), jnp.float32)
            run_mean = 0.1 * jax.random.normal(km, (fan_out,), jnp.float32)
            run_var = jnp.abs(jax.random.normal(kv, (fan_out,), jnp.float32)) + 0.5
            scale = gamma / jnp.sqrt(run_var + eps)
            shift = beta - run_mean * scale
        else:
            scale = jnp.ones((fan_out,), jnp.float32)
            shift = jnp.zeros((fan_out,), jnp.float32)
        params.append(
            dict(
                w_t=w.T,                       # (F_in, H) for x @ W^T
                b=b.reshape(1, -1),
                scale=scale.reshape(1, -1),
                shift=shift.reshape(1, -1),
            )
        )
    return params


def reference_forward(x, params, last_activation=True):
    """Pure-JAX reference mirroring the PyTorch op order (eval mode)."""
    layer_num = len(params)
    for i, p in enumerate(params):
        z = x @ p["w_t"] + p["b"]
        z = z * p["scale"] + p["shift"]
        if not (i == layer_num - 1 and not last_activation):
            z = jnp.maximum(z, 0.0)
        x = z
    return x


if __name__ == "__main__":
    key = jax.random.PRNGKey(0)
    kx, ke, kp = jax.random.split(key, 3)

    N, input_dim, hidden_size, layer_num = 16, 8, 32, 2

    x = jax.random.normal(kx, (N, input_dim), jnp.float32)
    edge_index = jax.random.randint(ke, (2, 24), 0, N)  # unused by forward

    params = make_params(kp, input_dim, hidden_size, layer_num, use_bn=True)

    out = mlp_encoder_forward(x, edge_index, params, last_activation=True)
    out = jax.block_until_ready(out)

    ref = reference_forward(x, params, last_activation=True)
    assert out.shape == (N, hidden_size)
    assert jnp.allclose(out, ref, atol=1e-4, rtol=1e-4), "mismatch vs reference"

    # Also check the last_activation=False path (last layer linear).
    out2 = jax.block_until_ready(
        mlp_encoder_forward(x, edge_index, params, last_activation=False)
    )
    ref2 = reference_forward(x, params, last_activation=False)
    assert jnp.allclose(out2, ref2, atol=1e-4, rtol=1e-4), "mismatch (no last act)"

    print("KERNEL_OK")
</pallas_src>

<mosaic_0001>
module attributes {stable_mosaic.version = 11 : i64} {
  func.func @_fused_mlp_kernel(%arg0: i32, %arg1: memref<16x128xf32, #tpu.memory_space<vmem>>, %arg2: memref<128x128xf32, #tpu.memory_space<vmem>>, %arg3: memref<1x128xf32, #tpu.memory_space<vmem>>, %arg4: memref<128x128xf32, #tpu.memory_space<vmem>>, %arg5: memref<1x128xf32, #tpu.memory_space<vmem>>, %arg6: memref<16x128xf32, #tpu.memory_space<vmem>>) attributes {dimension_semantics = [#tpu.dimension_semantics<parallel>], iteration_bounds = array<i64: 1>, scalar_prefetch = 0 : i64, scratch_operands = 0 : i64, tpu.core_type = #tpu.core_type<tc>, window_params = [{transform_indices = @transform_0, window_bounds = array<i64: 16, 128>}, {pipeline_mode = #tpu.pipeline_mode<synchronous>, transform_indices = @transform_1, window_bounds = array<i64: 128, 128>}, {pipeline_mode = #tpu.pipeline_mode<synchronous>, transform_indices = @transform_2, window_bounds = array<i64: 1, 128>}, {pipeline_mode = #tpu.pipeline_mode<synchronous>, transform_indices = @transform_3, window_bounds = array<i64: 128, 128>}, {pipeline_mode = #tpu.pipeline_mode<synchronous>, transform_indices = @transform_4, window_bounds = array<i64: 1, 128>}, {transform_indices = @transform_5, window_bounds = array<i64: 16, 128>}]} {
    %c0 = arith.constant 0 : index
    %c0_0 = arith.constant 0 : index
    %0 = vector.load %arg1[%c0, %c0_0] : memref<16x128xf32, #tpu.memory_space<vmem>>, vector<16x128xf32>
    %c0_1 = arith.constant 0 : index
    %c0_2 = arith.constant 0 : index
    %1 = vector.load %arg2[%c0_1, %c0_2] : memref<128x128xf32, #tpu.memory_space<vmem>>, vector<128x128xf32>
    %c0_3 = arith.constant 0 : index
    %c0_4 = arith.constant 0 : index
    %2 = vector.load %arg3[%c0_3, %c0_4] : memref<1x128xf32, #tpu.memory_space<vmem>>, vector<1x128xf32>
    %cst = arith.constant dense<0.000000e+00> : vector<16x128xf32>
    %3 = tpu.matmul %0, %1, %cst {dimension_numbers = #tpu.dot_dimension_numbers<[1], [0], [0], [1], [0, 0, 1, 1], [], []>} : vector<16x128xf32>, vector<128x128xf32>, vector<16x128xf32> -> vector<16x128xf32>
    %4 = vector.broadcast %2 : vector<1x128xf32> to vector<16x128xf32>
    %5 = arith.addf %3, %4 : vector<16x128xf32>
    %cst_5 = arith.constant 0.000000e+00 : f32
    %6 = vector.broadcast %cst_5 : f32 to vector<16x128xf32>
    %7 = arith.maximumf %5, %6 : vector<16x128xf32>
    %c0_6 = arith.constant 0 : index
    %c0_7 = arith.constant 0 : index
    %8 = vector.load %arg4[%c0_6, %c0_7] : memref<128x128xf32, #tpu.memory_space<vmem>>, vector<128x128xf32>
    %c0_8 = arith.constant 0 : index
    %c0_9 = arith.constant 0 : index
    %9 = vector.load %arg5[%c0_8, %c0_9] : memref<1x128xf32, #tpu.memory_space<vmem>>, vector<1x128xf32>
    %cst_10 = arith.constant dense<0.000000e+00> : vector<16x128xf32>
    %10 = tpu.matmul %7, %8, %cst_10 {dimension_numbers = #tpu.dot_dimension_numbers<[1], [0], [0], [1], [0, 0, 1, 1], [], []>} : vector<16x128xf32>, vector<128x128xf32>, vector<16x128xf32> -> vector<16x128xf32>
    %11 = vector.broadcast %9 : vector<1x128xf32> to vector<16x128xf32>
    %12 = arith.addf %10, %11 : vector<16x128xf32>
    %cst_11 = arith.constant 0.000000e+00 : f32
    %13 = vector.broadcast %cst_11 : f32 to vector<16x128xf32>
    %14 = arith.maximumf %12, %13 : vector<16x128xf32>
    %c0_12 = arith.constant 0 : index
    %c0_13 = arith.constant 0 : index
    %15 = vector.load %arg6[%c0_12, %c0_13] : memref<16x128xf32, #tpu.memory_space<vmem>>, vector<16x128xf32>
    tpu.vector_store %arg6[%c0_12, %c0_13], %14 {strides = array<i32>} : memref<16x128xf32, #tpu.memory_space<vmem>>, vector<16x128xf32>,
    return
  }
  func.func @transform_0(%arg0: i32) -> (i32, i32) {
    %c0_i32 = arith.constant 0 : i32
    %c0_i32_0 = arith.constant 0 : i32
    return %arg0, %c0_i32 : i32, i32
  }
  func.func @transform_1(%arg0: i32) -> (i32, i32) {
    %c0_i32 = arith.constant 0 : i32
    %c0_i32_0 = arith.constant 0 : i32
    %c0_i32_1 = arith.constant 0 : i32
    return %c0_i32, %c0_i32_0 : i32, i32
  }
  func.func @transform_2(%arg0: i32) -> (i32, i32) {
    %c0_i32 = arith.constant 0 : i32
    %c0_i32_0 = arith.constant 0 : i32
    %c0_i32_1 = arith.constant 0 : i32
    return %c0_i32, %c0_i32_0 : i32, i32
  }
  func.func @transform_3(%arg0: i32) -> (i32, i32) {
    %c0_i32 = arith.constant 0 : i32
    %c0_i32_0 = arith.constant 0 : i32
    %c0_i32_1 = arith.constant 0 : i32
    return %c0_i32, %c0_i32_0 : i32, i32
  }
  func.func @transform_4(%arg0: i32) -> (i32, i32) {
    %c0_i32 = arith.constant 0 : i32
    %c0_i32_0 = arith.constant 0 : i32
    %c0_i32_1 = arith.constant 0 : i32
    return %c0_i32, %c0_i32_0 : i32, i32
  }
  func.func @transform_5(%arg0: i32) -> (i32, i32) {
    %c0_i32 = arith.constant 0 : i32
    %c0_i32_0 = arith.constant 0 : i32
    return %arg0, %c0_i32 : i32, i32
  }
}

</mosaic_0001>

<bundles_post_ra>
// kernel: tpu_custom_call.1
= control target key start
LH: loop header
LB: loop body
LE: loop exit
PB: predicated region body
PF: predicated region fallthrough
CT: control target
= control target key end

     0   :  { %10 = vsyncpa [#allocation3], 0  ;;  %s665_s0 = inlined_call_operand.hbm [shape: f32[16,128], index: 0, kind: input, shape index: {}]   ;;  %s666_s1 = inlined_call_operand.hbm [shape: f32[128,128], index: 1, kind: input, shape index: {}]   ;;  %s667_s2 = inlined_call_operand.vmem [shape: f32[1,128], index: 2, kind: input, shape index: {}]   ;;  %s668_s3 = inlined_call_operand.hbm [shape: f32[128,128], index: 3, kind: input, shape index: {}]   ;;  %s669_s4 = inlined_call_operand.vmem [shape: f32[1,128], index: 4, kind: input, shape index: {}]   ;;  %s670_s5 = inlined_call_operand.hbm [shape: f32[16,128], index: 5, kind: output, shape index: {}]  }
   0x1   :  { %11 = vsyncpa [#allocation6], 0 }
   0x2   :  { %12 = vsyncpa [#allocation4], 0  ;;  %s556_s18 = smov [#allocation5]   ;;  %s557_s20 = smov [#allocation2]  }
   0x3   :  { %s30_s19 = sshll.u32 %s556_s18, 4  ;;  %s18_s21 = sshll.u32 %s557_s20, 4  ;;  %s31_s19 = int_to_ptr.vmem [resolvable:$true] %s30_s19  ;;  %s592_s21 = int_to_ptr.vmem [resolvable:$true] %s18_s21 }
   0x4   :  { %s462_s24 = scalar_lea.hbm %s666_s1, 2048 }
   0x5   :  { %p463_p0 = scmp.ne.s32.totalorder %s666_s1, %s462_s24  ;;  %p466_p1 = scmp.lt.u32.totalorder %s462_s24, %s666_s1 }
   0x7   :  { %p468_p2 = pnand %p466_p1, %p463_p0 }
   0x9   :  { %471 = shalt.err (!%p468_p2)
}
   0xa   :  { %s472_s29 = scalar_lea.vmem %s31_s19, 2048  ;;  %p477_p4 = scmp.lt.s32.totalorder %s31_s19, %s31_s19 }
   0xb   :  { %p473_p3 = scmp.ne.s32.totalorder %s31_s19, %s472_s29  ;;  %p478_p5 = scmp.lt.s32.totalorder %s472_s29, %s472_s29 }
   0xd   :  { %p479_p6 = por %p478_p5, %p477_p4 }
   0xf   :  { %p480_p7 = pnand %p479_p6, %p473_p3 }
  0x11   :  { %483 = shalt.err (!%p480_p7)
}
  0x12   :  { %s558_s30 = smov 128   ;;  %s559_s6 = smov 8  }
  0x13   :  { %36 = dma.hbm_to_vmem [thread:$0]  %s666_s1, 2048, %s31_s19, [#allocation6], %s558_s30, %s558_s30, %s559_s6  }
  0x14   :  { %s484_s11 = scalar_lea.hbm %s665_s0, 256 }
  0x15   :  { %p485_p8 = scmp.ne.s32.totalorder %s665_s0, %s484_s11  ;;  %p488_p9 = scmp.lt.u32.totalorder %s484_s11, %s665_s0 }
  0x17   :  { %p490_p10 = pnand %p488_p9, %p485_p8 }
  0x19   :  { %493 = shalt.err (!%p490_p10)
}
  0x1a   :  { %s494_s16 = scalar_lea.vmem %s592_s21, 256  ;;  %p499_p12 = scmp.lt.s32.totalorder %s592_s21, %s592_s21 }
  0x1b   :  { %p495_p11 = scmp.ne.s32.totalorder %s592_s21, %s494_s16  ;;  %p500_p13 = scmp.lt.s32.totalorder %s494_s16, %s494_s16 }
  0x1d   :  { %p501_p0 = por %p500_p13, %p499_p12 }
  0x1f   :  { %p502_p1 = pnand %p501_p0, %p495_p11 }
  0x21   :  { %505 = shalt.err (!%p502_p1)
}
  0x22   :  { %24 = dma.hbm_to_vmem [thread:$0]  %s665_s0, 256, %s592_s21, [#allocation3], %s558_s30, %s558_s30, %s559_s6  }
  0x23   :  { %s560_s18 = smov [#allocation7]   ;;  %s506_s23 = scalar_lea.hbm %s668_s3, 2048 }
  0x24   :  { %s44_s19 = sshll.u32 %s560_s18, 4  ;;  %p507_p2 = scmp.ne.s32.totalorder %s668_s3, %s506_s23  ;;  %s45_s19 = int_to_ptr.vmem [resolvable:$true] %s44_s19 }
  0x25   :  { %p510_p3 = scmp.lt.u32.totalorder %s506_s23, %s668_s3 }
  0x27   :  { %p512_p4 = pnand %p510_p3, %p507_p2 }
  0x29   :  { %515 = shalt.err (!%p512_p4)
}
  0x2a   :  { %s516_s28 = scalar_lea.vmem %s45_s19, 2048  ;;  %p521_p6 = scmp.lt.s32.totalorder %s45_s19, %s45_s19 }
  0x2b   :  { %p517_p5 = scmp.ne.s32.totalorder %s45_s19, %s516_s28  ;;  %p522_p7 = scmp.lt.s32.totalorder %s516_s28, %s516_s28 }
  0x2d   :  { %p523_p8 = por %p522_p7, %p521_p6 }
  0x2f   :  { %p524_p9 = pnand %p523_p8, %p517_p5 }
  0x31   :  { %527 = shalt.err (!%p524_p9)
}
  0x32   :  { %50 = dma.hbm_to_vmem [thread:$0]  %s668_s3, 2048, %s45_s19, [#allocation6], %s558_s30, %s558_s30, %s559_s6  }
  0x33   :  { %550 = dma.done.wait [#allocation3], 256  }
  0x34   :  { %551 = vsyncadd [#allocation3], 4294967040 }
  0x35   :  { %552 = dma.done.wait [#allocation6], 4096  }
  0x36   :  { %553 = vsyncadd [#allocation6], 4294963200  ;;  %v64_v0 = vld [vmem:[#allocation5] sm:$0xff]  ;;  %v65_v1 = vld [vmem:[#allocation5 + $0x8] sm:$0xff]  ;;  %s561_s9 = smov [#allocation8]  }
  0x37   :  { %v66_v2 = vld [vmem:[#allocation5 + $0x10] sm:$0xff]  ;;  %v392_v3 = vpack.c.bf16 %v65_v1, %v64_v0  ;;  %v67_v4 = vld [vmem:[#allocation5 + $0x18] sm:$0xff]  ;;  %v68_v6 = vld [vmem:[#allocation5 + $0x20] sm:$0xff]  ;;  %s271_s10 = sshll.u32 %s561_s9, 4  ;;  %s272_s10 = int_to_ptr.vmem [resolvable:$true] %s271_s10 }
  0x38   :  { %v396_v5 = vpack.c.bf16 %v67_v4, %v66_v2  ;;  %v69_v7 = vld [vmem:[#allocation5 + $0x28] sm:$0xff]  ;;  %v70_v9 = vld [vmem:[#allocation5 + $0x30] sm:$0xff]  ;;  %v71_v10 = vld [vmem:[#allocation5 + $0x38] sm:$0xff]  ;;  %p533_p11 = scmp.lt.s32.totalorder %s272_s10, %s272_s10 }
  0x39   :  { %393 = vmatprep.subr.bf16.mxu0 %v392_v3  ;;  %v400_v8 = vpack.c.bf16 %v69_v7, %v68_v6  ;;  %v62_v11 = vld [vmem:[#allocation2] sm:$0xff]  ;;  %v164_v12 = vld [vmem:[#allocation7] sm:$0xff]  ;;  %v165_v13 = vld [vmem:[#allocation7 + $0x8] sm:$0xff]  ;;  %v404_v20 = vpack.c.bf16 %v71_v10, %v70_v9 }
  0x3a   :  { %395 = vmatpush3.bf16.msra.mxu0 %v392_v3  ;;  %354 = vmatprep.mubr.f32.mxu0 %v62_v11  ;;  %v166_v14 = vld [vmem:[#allocation7 + $0x10] sm:$0xff]  ;;  %v424_v15 = vpack.c.bf16 %v165_v13, %v164_v12  ;;  %v167_v16 = vld [vmem:[#allocation7 + $0x18] sm:$0xff]  ;;  %v168_v18 = vld [vmem:[#allocation7 + $0x20] sm:$0xff] }
  0x3b   :  { %397 = vmatprep.subr.bf16.mxu0 %v396_v5  ;;  %v428_v17 = vpack.c.bf16 %v167_v16, %v166_v14  ;;  %v169_v19 = vld [vmem:[#allocation7 + $0x28] sm:$0xff]  ;;  %v72_v21 = vld [vmem:[#allocation5 + $0x40] sm:$0xff]  ;;  %v170_v24 = vld [vmem:[#allocation7 + $0x30] sm:$0xff] }
  0x3c   :  { %425 = vmatprep.subr.bf16.mxu1 %v424_v15  ;;  %v73_v22 = vld [vmem:[#allocation5 + $0x48] sm:$0xff]  ;;  %v432_v23 = vpack.c.bf16 %v169_v19, %v168_v18  ;;  %v171_v25 = vld [vmem:[#allocation7 + $0x38] sm:$0xff]  ;;  %v74_v27 = vld [vmem:[#allocation5 + $0x50] sm:$0xff] }
  0x3d   :  { %427 = vmatpush3.bf16.msra.mxu1 %v424_v15  ;;  %v408_v26 = vpack.c.bf16 %v73_v22, %v72_v21  ;;  %v75_v28 = vld [vmem:[#allocation5 + $0x58] sm:$0xff]  ;;  %v436_v29 = vpack.c.bf16 %v171_v25, %v170_v24  ;;  %v172_v30 = vld [vmem:[#allocation7 + $0x40] sm:$0xff]  ;;  %v173_v31 = vld [vmem:[#allocation7 + $0x48] sm:$0xff] }
  0x3e   :  { %399 = vmatpush3.bf16.msra.mxu0 %v396_v5  ;;  %429 = vmatprep.subr.bf16.mxu1 %v428_v17  ;;  %v412_v32 = vpack.c.bf16 %v75_v28, %v74_v27  ;;  %v76_v33 = vld [vmem:[#allocation5 + $0x60] sm:$0xff]  ;;  %v77_v34 = vld [vmem:[#allocation5 + $0x68] sm:$0xff]  ;;  %v440_v35 = vpack.c.bf16 %v173_v31, %v172_v30  ;;  %v174_v36 = vld [vmem:[#allocation7 + $0x50] sm:$0xff] }
  0x3f   :  { %401 = vmatprep.subr.bf16.mxu0 %v400_v8  ;;  %v175_v37 = vld [vmem:[#allocation7 + $0x58] sm:$0xff]  ;;  %v416_v38 = vpack.c.bf16 %v77_v34, %v76_v33  ;;  %v78_v39 = vld [vmem:[#allocation5 + $0x70] sm:$0xff]  ;;  %v176_v42 = vld [vmem:[#allocation7 + $0x60] sm:$0xff] }
  0x40   :  { %v79_v40 = vld [vmem:[#allocation5 + $0x78] sm:$0xff]  ;;  %v444_v41 = vpack.c.bf16 %v175_v37, %v174_v36  ;;  %v177_v43 = vld [vmem:[#allocation7 + $0x68] sm:$0xff]  ;;  %v178_v47 = vld [vmem:[#allocation7 + $0x70] sm:$0xff] }
  0x41   :  { %431 = vmatpush3.bf16.msra.mxu1 %v428_v17  ;;  %v420_v44 = vpack.c.bf16 %v79_v40, %v78_v39  ;;  %v448_v45 = vpack.c.bf16 %v177_v43, %v176_v42  ;;  %v63_v46 = vld [vmem:[#allocation2 + $0x8] sm:$0xff]  ;;  %v284_v50 = vld [vmem:[%s667_s2] ss:$0 sm:$0xff]  ;;  %s528_s2 = scalar_lea.vmem %s272_s10, 256 }
  0x42   :  { %403 = vmatpush3.bf16.msra.mxu0 %v400_v8  ;;  %433 = vmatprep.subr.bf16.mxu1 %v432_v23  ;;  %v179_v48 = vld [vmem:[#allocation7 + $0x78] sm:$0xff]  ;;  %v285_v57 = vld [vmem:[%s669_s4] ss:$0 sm:$0xff]  ;;  %p529_p10 = scmp.ne.s32.totalorder %s272_s10, %s528_s2  ;;  %p534_p12 = scmp.lt.s32.totalorder %s528_s2, %s528_s2 }
  0x43   :  { %405 = vmatprep.subr.bf16.mxu0 %v404_v20  ;;  %v452_v49 = vpack.c.bf16 %v179_v48, %v178_v47 }
  0x44   :  { %p535_p13 = por %p534_p12, %p533_p11 }
  0x45   :  { %435 = vmatpush3.bf16.msra.mxu1 %v432_v23 }
  0x46   :  { %407 = vmatpush3.bf16.msra.mxu0 %v404_v20  ;;  %437 = vmatprep.subr.bf16.mxu1 %v436_v29  ;;  %p536_p0 = pnand %p535_p13, %p529_p10 }
  0x47   :  { %409 = vmatprep.subr.bf16.mxu0 %v408_v26 }
  0x49   :  { %439 = vmatpush3.bf16.msra.mxu1 %v436_v29 }
  0x4a   :  { %411 = vmatpush3.bf16.msra.mxu0 %v408_v26  ;;  %441 = vmatprep.subr.bf16.mxu1 %v440_v35 }
  0x4b   :  { %413 = vmatprep.subr.bf16.mxu0 %v412_v32 }
  0x4d   :  { %443 = vmatpush3.bf16.msra.mxu1 %v440_v35 }
  0x4e   :  { %415 = vmatpush3.bf16.msra.mxu0 %v412_v32  ;;  %445 = vmatprep.subr.bf16.mxu1 %v444_v41 }
  0x4f   :  { %417 = vmatprep.subr.bf16.mxu0 %v416_v38 }
  0x51   :  { %447 = vmatpush3.bf16.msra.mxu1 %v444_v41 }
  0x52   :  { %419 = vmatpush3.bf16.msra.mxu0 %v416_v38  ;;  %449 = vmatprep.subr.bf16.mxu1 %v448_v45 }
  0x53   :  { %421 = vmatprep.subr.bf16.mxu0 %v420_v44 }
  0x55   :  { %451 = vmatpush3.bf16.msra.mxu1 %v448_v45 }
  0x56   :  { %423 = vmatpush3.bf16.msra.mxu0 %v420_v44  ;;  %453 = vmatprep.subr.bf16.mxu1 %v452_v49 }
  0x59   :  { %355 = vmatmul.mubr.f32.vlgmr.msra.gmra.mrb[0].mxu0 %v63_v46  ;;  %455 = vmatpush3.bf16.msra.mxu1 %v452_v49 }
 0x12c   :  { %v356_v51 = vpop.f32.mrb[0].mxu0 }
 0x12d   :  { %v159_v52 = vadd.f32 %v356_v51, %v284_v50  ;;  %v153_v53 = vpop.f32.mrb[1].mxu0 }
 0x12e   :  { %v154_v54 = vadd.f32 %v284_v50, %v153_v53 }
 0x12f   :  { %v163_v56 = vmax.f32 %v159_v52, 0.0 }
 0x130   :  { %v162_v55 = vmax.f32 %v154_v54, 0.0 }
 0x132   :  { %389 = vmatprep.mubr.f32.mxu1 %v162_v55 }
 0x133   :  { %390 = vmatmul.mubr.f32.vlgmr.msra.gmra.mrb[0].mxu1 %v163_v56 }
 0x206   :  { %v391_v58 = vpop.f32.mrb[0].mxu1 }
 0x207   :  { %v259_v59 = vadd.f32 %v391_v58, %v285_v57  ;;  %v253_v60 = vpop.f32.mrb[1].mxu1 }
 0x208   :  { %v254_v61 = vadd.f32 %v285_v57, %v253_v60 }
 0x209   :  { %v263_v62 = vmax.f32 %v259_v59, 0.0 }
 0x20a   :  { %v262_v63 = vmax.f32 %v254_v61, 0.0 }
 0x20b   :  { %265 = vst [vmem:[#allocation8 + $0x8] sm:$0xff] %v263_v62 }
 0x20c   :  { %264 = vst [vmem:[#allocation8] sm:$0xff] %v262_v63 }
 0x20d   :  { %539 = shalt.err (!%p536_p0)
}
 0x20e   :  { %s540_s12 = scalar_lea.hbm %s670_s5, 256 }
 0x20f   :  { %p541_p1 = scmp.ne.s32.totalorder %s670_s5, %s540_s12  ;;  %p544_p2 = scmp.lt.u32.totalorder %s540_s12, %s670_s5 }
 0x211   :  { %p546_p3 = pnand %p544_p2, %p541_p1 }
 0x213   :  { %549 = shalt.err (!%p546_p3)
}
 0x214   :  { %277 = dma.vmem_to_hbm [thread:$0]  %s272_s10, 256, %s670_s5, [#allocation4], %s558_s30, %s558_s30, %s559_s6  }
 0x215   :  { %554 = dma.done.wait [#allocation4], 256  }
 0x216   :  { %555 = vsyncadd [#allocation4], 4294967040 }
 0x217   :  { %281 = vsyncpa [#allocation3], 1 }
 0x218   :  { %282 = vsyncpa [#allocation6], 1 }
 0x219   :  { %283 = vsyncpa [#allocation4], 1 }

</bundles_post_ra>
